<compile_context>
chip_gen: v5e
topology: v5e:2x2
jax: 0.10.0
libtpu: 0.0.40
codegen_flags: <defaults>
</compile_context>

<pallas_src>
import functools

import jax
import jax.numpy as jnp
from jax import lax
from jax.experimental import pallas as pl
from jax.experimental.pallas import tpu as pltpu


def _activation(x, kind):
    if kind == "relu":
        return jnp.maximum(x, 0.0)
    if kind == "tanh":
        return jnp.tanh(x)
    raise ValueError(f"unsupported activation: {kind}")


def _neural_net_moves_kernel(moves_ref, w1_ref, w2_ref, packed_ref, out_ref,
                             *, h1_dim, h2_dim, activation):
    # moves_ref : (TM, F)     float32
    # w1_ref    : (F,  H1)    float32 or bfloat16 (pre-transposed linear_moves.weight)
    # w2_ref    : (H1, H2)    float32 or bfloat16 (pre-transposed linear_hidden.weight)
    # packed_ref: (4, Hmax)   float32  rows = [b1 | b2 | linear_output weight row | bo]
    # out_ref   : (1, 1, TM)  float32  one lane-dense row of logits
    x = moves_ref[...].astype(jnp.float32)          # (TM, F)
    mm_dtype = w1_ref.dtype

    b1 = packed_ref[0:1, :h1_dim]                   # (1, H1)
    b2 = packed_ref[1:2, :h2_dim]                   # (1, H2)
    wo = packed_ref[2:3, :h2_dim]                   # (1, H2)
    bo = packed_ref[3:4, 0:1]                       # (1, 1)

    # ---- linear_moves + activation ----
    h1 = jnp.dot(x.astype(mm_dtype), w1_ref[...],
                 preferred_element_type=jnp.float32) + b1            # (TM, H1)
    h1 = _activation(h1, activation)

    # TODO(synk): nn.Dropout(0.1) (train-mode) has no deterministic Pallas equivalent;
    # eval-mode (identity) semantics are implemented.

    # ---- linear_hidden + activation ----
    h2 = jnp.dot(h1.astype(mm_dtype), w2_ref[...],
                 preferred_element_type=jnp.float32) + b2            # (TM, H2)
    h2 = _activation(h2, activation)

    # ---- output head, lane-dense: (1, H2) . (TM, H2)^T -> (1, TM) ----
    logits = lax.dot_general(
        wo.astype(mm_dtype), h2.astype(mm_dtype),
        dimension_numbers=(((1,), (1,)), ((), ())),
        preferred_element_type=jnp.float32) + bo                     # (1, TM)

    out_ref[...] = logits.reshape(out_ref.shape)


def init_params(key, num_features_moves, hidden_units_1, hidden_units_2):
    """PyTorch-layout parameters: weight[out, in], bias[out]."""
    F, H1, H2 = num_features_moves, hidden_units_1, hidden_units_2
    ks = jax.random.split(key, 6)
    s = 0.1
    return {
        "linear_moves_w": jax.random.normal(ks[0], (H1, F), jnp.float32) * s,
        "linear_moves_b": jax.random.normal(ks[1], (H1,), jnp.float32) * s,
        "linear_hidden_w": jax.random.normal(ks[2], (H2, H1), jnp.float32) * s,
        "linear_hidden_b": jax.random.normal(ks[3], (H2,), jnp.float32) * s,
        "linear_output_w": jax.random.normal(ks[4], (1, H2), jnp.float32) * s,
        "linear_output_b": jax.random.normal(ks[5], (1,), jnp.float32) * s,
    }


@functools.partial(jax.jit,
                   static_argnames=("activation", "use_bf16_matmul", "tile_m"))
def neural_net_moves_forward(board, sf_eval, moves, params, *,
                             activation="relu", use_bf16_matmul=False, tile_m=128):
    """board: (F_b,), sf_eval: (F_s,), moves: (N, F) -> logits: (N,)

    board / sf_eval are accepted (matching the module's input tuple) but unused,
    exactly like NeuralNetMoves.forward.
    """
    del board, sf_eval
    N, F = moves.shape
    H1 = params["linear_moves_w"].shape[0]
    H2 = params["linear_hidden_w"].shape[0]
    h_max = max(H1, H2)

    mm_dtype = jnp.bfloat16 if use_bf16_matmul else jnp.float32

    # pre-transpose weights so the kernel only does x @ W
    w1 = params["linear_moves_w"].T.astype(mm_dtype)     # (F,  H1)
    w2 = params["linear_hidden_w"].T.astype(mm_dtype)    # (H1, H2)

    # pack all tiny parameters into a single array -> one DMA
    packed = jnp.zeros((4, h_max), jnp.float32)
    packed = packed.at[0, :H1].set(params["linear_moves_b"].astype(jnp.float32))
    packed = packed.at[1, :H2].set(params["linear_hidden_b"].astype(jnp.float32))
    packed = packed.at[2, :H2].set(params["linear_output_w"][0].astype(jnp.float32))
    packed = packed.at[3, 0].set(params["linear_output_b"][0].astype(jnp.float32))

    # pad rows to a multiple of the row tile (padded rows are discarded at the end)
    grid_m = pl.cdiv(N, tile_m)
    n_pad = grid_m * tile_m
    moves_p = jnp.zeros((n_pad, F), jnp.float32).at[:N, :].set(
        moves.astype(jnp.float32))

    kernel = functools.partial(_neural_net_moves_kernel,
                               h1_dim=H1, h2_dim=H2, activation=activation)

    flops = 2 * n_pad * (F * H1 + H1 * H2 + H2)
    transcendentals = n_pad * (H1 + H2) if activation == "tanh" else 0
    bytes_accessed = int(moves_p.size * 4 + w1.size * w1.dtype.itemsize
                         + w2.size * w2.dtype.itemsize + packed.size * 4 + n_pad * 4)

    out = pl.pallas_call(
        kernel,
        out_shape=jax.ShapeDtypeStruct((grid_m, 1, tile_m), jnp.float32),
        grid=(grid_m,),
        in_specs=[
            pl.BlockSpec((tile_m, F), lambda i: (i, 0)),     # moves row tile
            pl.BlockSpec((F, H1), lambda i: (0, 0)),         # w1 (resident across grid)
            pl.BlockSpec((H1, H2), lambda i: (0, 0)),        # w2 (resident across grid)
            pl.BlockSpec((4, h_max), lambda i: (0, 0)),      # packed biases / head
        ],
        out_specs=pl.BlockSpec((1, 1, tile_m), lambda i: (i, 0, 0)),
        compiler_params=pltpu.CompilerParams(
            dimension_semantics=("parallel",)),
        cost_estimate=pl.CostEstimate(
            flops=flops, transcendentals=transcendentals,
            bytes_accessed=bytes_accessed),
    )(moves_p, w1, w2, packed)

    return out.reshape(n_pad)[:N]


def _reference(moves, params, activation="relu"):
    act = (lambda v: jnp.maximum(v, 0.0)) if activation == "relu" else jnp.tanh
    h1 = act(moves @ params["linear_moves_w"].T + params["linear_moves_b"])
    h2 = act(h1 @ params["linear_hidden_w"].T + params["linear_hidden_b"])
    return (h2 @ params["linear_output_w"].T + params["linear_output_b"])[:, 0]


if __name__ == "__main__":
    # small shapes consistent with the module
    num_features_moves = 32
    hidden_units_1 = 64
    hidden_units_2 = 32
    num_moves = 200           # non-multiple of 128 -> exercises padding + 2-program grid
    num_features_board = 16
    num_features_sf = 8

    key = jax.random.PRNGKey(0)
    kp, kb, ks, km = jax.random.split(key, 4)

    params = init_params(kp, num_features_moves, hidden_units_1, hidden_units_2)
    board = jax.random.normal(kb, (num_features_board,), jnp.float32)
    sf_eval = jax.random.normal(ks, (num_features_sf,), jnp.float32)
    moves = jax.random.normal(km, (num_moves, num_features_moves), jnp.float32)

    logits = neural_net_moves_forward(board, sf_eval, moves, params)
    jax.block_until_ready(logits)
    assert logits.shape == (num_moves,)

    ref = _reference(moves, params)
    max_err = float(jnp.max(jnp.abs(logits - ref)))
    assert jnp.allclose(logits, ref, atol=1e-4, rtol=1e-4), max_err

    print("KERNEL_OK")
</pallas_src>

<mosaic_0001>
module attributes {stable_mosaic.version = 11 : i64} {
  func.func @_neural_net_moves_kernel(%arg0: i32, %arg1: memref<128x32xf32, #tpu.memory_space<vmem>>, %arg2: memref<32x64xf32, #tpu.memory_space<vmem>>, %arg3: memref<64x32xf32, #tpu.memory_space<vmem>>, %arg4: memref<4x64xf32, #tpu.memory_space<vmem>>, %arg5: memref<1x1x128xf32, #tpu.memory_space<vmem>>) attributes {dimension_semantics = [#tpu.dimension_semantics<parallel>], iteration_bounds = array<i64: 2>, scalar_prefetch = 0 : i64, scratch_operands = 0 : i64, tpu.core_type = #tpu.core_type<tc>, window_params = [{transform_indices = @transform_0, window_bounds = array<i64: 128, 32>}, {pipeline_mode = #tpu.pipeline_mode<synchronous>, transform_indices = @transform_1, window_bounds = array<i64: 32, 64>}, {pipeline_mode = #tpu.pipeline_mode<synchronous>, transform_indices = @transform_2, window_bounds = array<i64: 64, 32>}, {pipeline_mode = #tpu.pipeline_mode<synchronous>, transform_indices = @transform_3, window_bounds = array<i64: 4, 64>}, {transform_indices = @transform_4, window_bounds = array<i64: 1, 1, 128>}]} {
    %c0 = arith.constant 0 : index
    %c0_0 = arith.constant 0 : index
    %0 = vector.load %arg1[%c0, %c0_0] : memref<128x32xf32, #tpu.memory_space<vmem>>, vector<128x32xf32>
    %c0_1 = arith.constant 0 : index
    %c0_2 = arith.constant 0 : index
    %1 = vector.load %arg4[%c0_1, %c0_2] : memref<4x64xf32, #tpu.memory_space<vmem>>, vector<1x64xf32>
    %c1 = arith.constant 1 : index
    %c0_3 = arith.constant 0 : index
    %2 = vector.load %arg4[%c1, %c0_3] : memref<4x64xf32, #tpu.memory_space<vmem>>, vector<1x32xf32>
    %c2 = arith.constant 2 : index
    %c0_4 = arith.constant 0 : index
    %3 = vector.load %arg4[%c2, %c0_4] : memref<4x64xf32, #tpu.memory_space<vmem>>, vector<1x32xf32>
    %c3 = arith.constant 3 : index
    %c0_5 = arith.constant 0 : index
    %4 = vector.load %arg4[%c3, %c0_5] : memref<4x64xf32, #tpu.memory_space<vmem>>, vector<1x1xf32>
    %c0_6 = arith.constant 0 : index
    %c0_7 = arith.constant 0 : index
    %5 = vector.load %arg2[%c0_6, %c0_7] : memref<32x64xf32, #tpu.memory_space<vmem>>, vector<32x64xf32>
    %cst = arith.constant dense<0.000000e+00> : vector<128x64xf32>
    %6 = tpu.matmul %0, %5, %cst {dimension_numbers = #tpu.dot_dimension_numbers<[1], [0], [0], [1], [0, 0, 1, 1], [], []>} : vector<128x32xf32>, vector<32x64xf32>, vector<128x64xf32> -> vector<128x64xf32>
    %7 = vector.broadcast %1 : vector<1x64xf32> to vector<128x64xf32>
    %8 = arith.addf %6, %7 : vector<128x64xf32>
    %cst_8 = arith.constant 0.000000e+00 : f32
    %9 = vector.broadcast %cst_8 : f32 to vector<128x64xf32>
    %10 = arith.maximumf %8, %9 : vector<128x64xf32>
    %c0_9 = arith.constant 0 : index
    %c0_10 = arith.constant 0 : index
    %11 = vector.load %arg3[%c0_9, %c0_10] : memref<64x32xf32, #tpu.memory_space<vmem>>, vector<64x32xf32>
    %cst_11 = arith.constant dense<0.000000e+00> : vector<128x32xf32>
    %12 = tpu.matmul %10, %11, %cst_11 {dimension_numbers = #tpu.dot_dimension_numbers<[1], [0], [0], [1], [0, 0, 1, 1], [], []>} : vector<128x64xf32>, vector<64x32xf32>, vector<128x32xf32> -> vector<128x32xf32>
    %13 = vector.broadcast %2 : vector<1x32xf32> to vector<128x32xf32>
    %14 = arith.addf %12, %13 : vector<128x32xf32>
    %cst_12 = arith.constant 0.000000e+00 : f32
    %15 = vector.broadcast %cst_12 : f32 to vector<128x32xf32>
    %16 = arith.maximumf %14, %15 : vector<128x32xf32>
    %cst_13 = arith.constant dense<0.000000e+00> : vector<1x128xf32>
    %17 = tpu.matmul %3, %16, %cst_13 {dimension_numbers = #tpu.dot_dimension_numbers<[1], [1], [0], [0], [0, 0, 1, 0], [], []>} : vector<1x32xf32>, vector<128x32xf32>, vector<1x128xf32> -> vector<1x128xf32>
    %18 = vector.broadcast %4 : vector<1x1xf32> to vector<1x128xf32>
    %19 = arith.addf %17, %18 : vector<1x128xf32>
    %20 = vector.shape_cast %19 : vector<1x128xf32> to vector<1x1x128xf32>
    %c0_14 = arith.constant 0 : index
    %c0_15 = arith.constant 0 : index
    %c0_16 = arith.constant 0 : index
    %21 = vector.load %arg5[%c0_14, %c0_15, %c0_16] : memref<1x1x128xf32, #tpu.memory_space<vmem>>, vector<1x1x128xf32>
    tpu.vector_store %arg5[%c0_14, %c0_15, %c0_16], %20 {strides = array<i32>} : memref<1x1x128xf32, #tpu.memory_space<vmem>>, vector<1x1x128xf32>,
    return
  }
  func.func @transform_0(%arg0: i32) -> (i32, i32) {
    %c0_i32 = arith.constant 0 : i32
    %c0_i32_0 = arith.constant 0 : i32
    return %arg0, %c0_i32 : i32, i32
  }
  func.func @transform_1(%arg0: i32) -> (i32, i32) {
    %c0_i32 = arith.constant 0 : i32
    %c0_i32_0 = arith.constant 0 : i32
    %c0_i32_1 = arith.constant 0 : i32
    return %c0_i32, %c0_i32_0 : i32, i32
  }
  func.func @transform_2(%arg0: i32) -> (i32, i32) {
    %c0_i32 = arith.constant 0 : i32
    %c0_i32_0 = arith.constant 0 : i32
    %c0_i32_1 = arith.constant 0 : i32
    return %c0_i32, %c0_i32_0 : i32, i32
  }
  func.func @transform_3(%arg0: i32) -> (i32, i32) {
    %c0_i32 = arith.constant 0 : i32
    %c0_i32_0 = arith.constant 0 : i32
    %c0_i32_1 = arith.constant 0 : i32
    return %c0_i32, %c0_i32_0 : i32, i32
  }
  func.func @transform_4(%arg0: i32) -> (i32, i32, i32) {
    %c0_i32 = arith.constant 0 : i32
    %c0_i32_0 = arith.constant 0 : i32
    %c0_i32_1 = arith.constant 0 : i32
    return %arg0, %c0_i32, %c0_i32_0 : i32, i32, i32
  }
}

</mosaic_0001>

<bundles_post_ra>
// kernel: neural_net_moves_forward.1
= control target key start
LH: loop header
LB: loop body
LE: loop exit
PB: predicated region body
PF: predicated region fallthrough
CT: control target
= control target key end

     0   :  { %9 = vsyncpa [#allocation3], 0  ;;  %s1058_s0 = inlined_call_operand.vmem [shape: f32[256,32], index: 0, kind: input, shape index: {}]   ;;  %s1059_s1 = inlined_call_operand.vmem [shape: f32[32,64], index: 1, kind: input, shape index: {}]   ;;  %s1060_s2 = inlined_call_operand.vmem [shape: f32[64,32], index: 2, kind: input, shape index: {}]   ;;  %s1061_s3 = inlined_call_operand.vmem [shape: f32[4,64], index: 3, kind: input, shape index: {}]   ;;  %s1062_s4 = inlined_call_operand.hbm [shape: f32[2,1,128], index: 4, kind: output, shape index: {}]  }
   0x1   :  { %11 = vsyncpa [#allocation3 + $0x1], 0  ;;  %s838_s15 = smov 0   ;;  %s840_s16 = smov 0  }
   0x2   :  { %s842_s17 = smov 0   ;;  %s844_s18 = smov 0  }
   0x3 LB: > { %s859_s19 = sadd.s32 4294967295, %s810_s18   ;;  %s636_s20 = sadd.s32 4294967294, %s810_s18   ;;  %s810_s18 = sphi %s844_s18, %s1068_s18   ;;  %s806_s17 = sphi %s842_s17, %s1067_s17   ;;  %s802_s16 = sphi %s840_s16, %s1066_s16   ;;  %s798_s15 = sphi %s838_s15, %s1065_s15  }
   0x4   : > { %s863_s21 = sadd.s32 1, %s810_s18   ;;  %s113_s22 = sadd.s32 1, %s806_s17 }
   0x5   : > { %s110_s23 = ssub.s32 %s810_s18, %s863_s21  ;;  %p123_p0 = scmp.ne.s32.totalorder %s806_s17, %s802_s16 }
   0x6   : > { %p111_p1 = scmp.eq.s32.totalorder %s110_s23, 0  ;;  %p124_p2 = scmp.eq.s32.totalorder %s859_s19, 1 }
   0x7   : > { %p129_p3 = scmp.ne.s32.totalorder %s802_s16, %s798_s15  ;;  %p130_p4 = scmp.eq.s32.totalorder %s636_s20, 1 }
   0x8   : > { %s874_s24 = scalar_select %p111_p1, %s806_s17, %s113_s22  }
   0x9   : > { %p876_p5 = por %p124_p2, %p123_p0  ;;  %p880_p6 = por %p130_p4, %p129_p3 }
   0xa   : > { %p639_p7 = scmp.ge.s32.totalorder %s810_s18, 1  ;;  %p166_p8 = scmp.lt.s32.totalorder %s810_s18, 3 }
   0xc   : > { %p167_p9 = pnand %p639_p7, %p166_p8 }
   0xd   : > { %s640_s5 = sshll.u32 (!%p167_p9), %s859_s19, 4  ;;  %s189_s30 = sand.u32 (!%p167_p9), 1, %s802_s16  }
   0xe   : > { %170 = sbr.rel (%p167_p9) target bundleno = 613 (0x265), region = 36  ;;  %p192_p10 = scmp.lt.s32.totalorder (!%p167_p9), %s640_s5, 31 }
   0xf   : > { %s577_s7 = scalar_lea.hbm (!%p167_p9), %s1062_s4, %s859_s19  ;;  %s190_s8 = scalar_lea.vmem (!%p167_p9), [#allocation2], %s189_s30 }
  0x10   : > { %s579_s9 = sshll.u32 (!%p167_p9), %s190_s8, 4  ;;  %s569_s11 = scalar_lea.sflag (!%p167_p9), [#allocation3], %s189_s30  ;;  %s580_s9 = int_to_ptr.vmem [resolvable:$true] %s579_s9 }
  0x11   : > { %s768_s19 = scalar_lea.hbm (!%p167_p9), %s1062_s4, 2 }
  0x13   : > { %v220_v0 = vld [vmem:[%s1059_s1 + $0x18] sm:$0xff]  ;;  %v219_v1 = vld [vmem:[%s1059_s1 + $0x10] sm:$0xff]  ;;  %v218_v2 = vld [vmem:[%s1059_s1 + $0x8] sm:$0xff]  ;;  %s1070_s5 = smov (!%p192_p10, %s640_s5), 31  ;;  %vm222_vm0 = vcmask 261120   ;;  %vm361_vm1 = vcmask 523264  }
  0x14   : > { %283 = vmatpush.msra.mxu0 %v220_v0  ;;  %693 = vmatpush.msra.mxu3 %v220_v0  ;;  %v217_v3 = vld [vmem:[%s1059_s1] sm:$0xff]  ;;  %s641_s10 = sshll.u32 %s1070_s5, 3  ;;  %v359_v12 = vld [vmem:[%s1060_s2 + $0x38] sm:$0xff]  ;;  %v358_v13 = vld [vmem:[%s1060_s2 + $0x30] sm:$0xff] }
  0x15   : > { %s902_s13 = scalar_lea.vmem %s1058_s0, %s641_s10  ;;  %418 = vmatpush.msra.mxu1 %v359_v12  ;;  %v357_v14 = vld [vmem:[%s1060_s2 + $0x28] sm:$0xff]  ;;  %v356_v16 = vld [vmem:[%s1060_s2 + $0x20] sm:$0xff]  ;;  %v355_v18 = vld [vmem:[%s1060_s2 + $0x18] sm:$0xff]  ;;  %s581_s10 = sshll.u32 %s577_s7, 4  ;;  %s582_s10 = int_to_ptr.hbm [resolvable:$true] %s581_s10 }
  0x16   : > { %284 = vmatpush.msra.mxu0 %v219_v1  ;;  %694 = vmatpush.msra.mxu3 %v219_v1  ;;  %v197_v4 = vld [vmem:[%s902_s13] sm:$0xff]  ;;  %v198_v5 = vld [vmem:[%s902_s13 + $0x8] sm:$0xff]  ;;  %v199_v6 = vld [vmem:[%s902_s13 + $0x10] sm:$0xff]  ;;  %s762_s12 = sshra.s32 %s582_s10, 4  ;;  %s763_s12 = int_to_ptr.hbm [resolvable:$true] %s762_s12 }
  0x17   : > { %v200_v7 = vld [vmem:[%s902_s13 + $0x18] sm:$0xff]  ;;  %v201_v8 = vld [vmem:[%s902_s13 + $0x20] sm:$0xff]  ;;  %v202_v9 = vld [vmem:[%s902_s13 + $0x28] sm:$0xff]  ;;  %419 = vmatpush.msra.mxu1 %v358_v13  ;;  %p769_p0 = scmp.lt.s32.totalorder %s763_s12, %s1062_s4 }
  0x18   : > { %285 = vmatpush.msra.mxu0 %v218_v2  ;;  %695 = vmatpush.msra.mxu3 %v218_v2  ;;  %v203_v10 = vld [vmem:[%s902_s13 + $0x30] sm:$0xff]  ;;  %v208_v11 = vld [vmem:[%s902_s13 + $0x58] sm:$0xff]  ;;  %v209_v17 = vld [vmem:[%s902_s13 + $0x60] sm:$0xff] }
  0x19   : > { %v204_v15 = vld [vmem:[%s902_s13 + $0x38] sm:$0xff]  ;;  %420 = vmatpush.msra.mxu1 %v357_v14  ;;  %v205_v19 = vld [vmem:[%s902_s13 + $0x40] sm:$0xff]  ;;  %v210_v20 = vld [vmem:[%s902_s13 + $0x68] sm:$0xff] }
  0x1a   : > { %286 = vmatpush.msra.mxu0 %v217_v3  ;;  %696 = vmatpush.msra.mxu3 %v217_v3  ;;  %v206_v21 = vld [vmem:[%s902_s13 + $0x48] sm:$0xff]  ;;  %v211_v22 = vld [vmem:[%s902_s13 + $0x70] sm:$0xff]  ;;  %v212_v24 = vld [vmem:[%s902_s13 + $0x78] sm:$0xff] }
  0x1b   : > { %642 = vmatmul.msk.f32.vlgmr.msra.gmra.mxu0 %vm222_vm0, %v197_v4  ;;  %653 = vmatmul.msk.f32.vlgmr.msra.gmra.mxu3 %vm222_vm0, %v208_v11  ;;  %v207_v23 = vld [vmem:[%s902_s13 + $0x50] sm:$0xff]  ;;  %v353_v26 = vld [vmem:[%s1060_s2 + $0x8] sm:$0xff]  ;;  %v352_v27 = vld [vmem:[%s1060_s2] sm:$0xff]  ;;  %s764_s13 = scalar_lea.hbm %s763_s12, 1 }
  0x1c   : > { %697 = vmatpush.msrb.mxu3 %v359_v12  ;;  %421 = vmatpush.msra.mxu1 %v356_v16  ;;  %v354_v25 = vld [vmem:[%s1060_s2 + $0x10] sm:$0xff]  ;;  %v963_v28 = vld [vmem:[%s1061_s3] ss:$0 sm:$0xff]  ;;  %p765_p11 = scmp.ne.s32.totalorder %s763_s12, %s764_s13  ;;  %p770_p1 = scmp.lt.s32.totalorder %s768_s19, %s764_s13 }
  0x1e   : > { %698 = vmatpush.msrb.mxu3 %v358_v13  ;;  %422 = vmatpush.msra.mxu1 %v355_v18  ;;  %p766_p12 = pnand %p765_p11, %p876_p5  ;;  %p771_p2 = por %p770_p1, %p769_p0 }
  0x20   : > { %699 = vmatpush.msrb.mxu3 %v357_v14  ;;  %423 = vmatpush.msra.mxu1 %v354_v25  ;;  %p767_p13 = pneg %p766_p12 }
  0x22   : > { %700 = vmatpush.msrb.mxu3 %v356_v16  ;;  %424 = vmatpush.msra.mxu1 %v353_v26  ;;  %p772_p3 = pnand %p771_p2, %p767_p13 }
  0x23   : > { %643 = vmatmul.msk.f32.gmra.mxu0 %vm222_vm0, %v198_v5  ;;  %654 = vmatmul.msk.f32.gmra.mxu3 %vm222_vm0, %v209_v17 }
  0x24   : > { %701 = vmatpush.msrb.mxu3 %v355_v18  ;;  %425 = vmatpush.msra.mxu1 %v352_v27 }
  0x26   : > { %702 = vmatpush.msrb.mxu3 %v354_v25  ;;  %v747_v25 = vld [vmem:[%s1061_s3 + $0x1] ss:$0 sm:$0xff] }
  0x28   : > { %703 = vmatpush.msrb.mxu3 %v353_v26 }
  0x2a   : > { %704 = vmatpush.msrb.mxu3 %v352_v27 }
  0x2b   : > { %644 = vmatmul.msk.f32.gmra.mxu0 %vm222_vm0, %v199_v6  ;;  %655 = vmatmul.msk.f32.gmra.mxu3 %vm222_vm0, %v210_v20 }
  0x33   : > { %645 = vmatmul.msk.f32.gmra.mxu0 %vm222_vm0, %v200_v7  ;;  %656 = vmatmul.msk.f32.gmra.mxu3 %vm222_vm0, %v211_v22 }
  0x3b   : > { %646 = vmatmul.msk.f32.gmra.mxu0 %vm222_vm0, %v201_v8  ;;  %657 = vmatmul.msk.f32.gmra.mxu3 %vm222_vm0, %v212_v24 }
  0x43   : > { %647 = vmatmul.msk.f32.gmra.mxu0 %vm222_vm0, %v202_v9 }
  0x4b   : > { %648 = vmatmul.msk.f32.gmra.mxu0 %vm222_vm0, %v203_v10 }
  0x53   : > { %649 = vmatmul.msk.f32.gmra.mxu0 %vm222_vm0, %v204_v15 }
  0x5b   : > { %650 = vmatmul.msk.f32.gmra.mxu0 %vm222_vm0, %v205_v19 }
  0x63   : > { %651 = vmatmul.msk.f32.gmra.mxu0 %vm222_vm0, %v206_v21 }
  0x6b   : > { %652 = vmatmul.msk.f32.gmra.mxu0 %vm222_vm0, %v207_v23 }
  0x98   : > { %v288_v29 = vpop.f32.mrf.mxu0 }
  0x99   : > { %v289_v30 = vadd.f32 %v963_v28, %v288_v29 }
  0x9b   : > { %v336_v31 = vmax.f32 %v289_v30, 0.0 }
  0x9d   : > { %658 = vmatmul.msk.f32.vlgmr.msra.gmra.mxu1 %vm361_vm1, %v336_v31 }
  0x9e   : > { %v321_v58 = vpop.f32.mrf.mxu3 }
  0x9f   : > { %v322_v0 = vadd.f32 %v963_v28, %v321_v58 }
  0xa0   : > { %v291_v32 = vpop.f32.mrf.mxu0 }
  0xa1   : > { %v292_v33 = vadd.f32 %v963_v28, %v291_v32  ;;  %v347_v1 = vmax.f32 %v322_v0, 0.0  ;;  %v215_v0 = vld [vmem:[%s1061_s3 + $0x2] sm:$0x1] }
  0xa3   : > { %v337_v34 = vmax.f32 %v292_v33, 0.0 }
  0xa5   : > { %659 = vmatmul.msk.f32.gmra.mxu1 %vm361_vm1, %v337_v34 }
  0xa6   : > { %v324_v63 = vpop.f32.mrf.mxu3 }
  0xa7   : > { %v325_v2 = vadd.f32 %v963_v28, %v324_v63 }
  0xa8   : > { %v294_v35 = vpop.f32.mrf.mxu0 }
  0xa9   : > { %v295_v36 = vadd.f32 %v963_v28, %v294_v35  ;;  %v348_v4 = vmax.f32 %v325_v2, 0.0 }
  0xab   : > { %v338_v37 = vmax.f32 %v295_v36, 0.0 }
  0xad   : > { %660 = vmatmul.msk.f32.gmra.mxu1 %vm361_vm1, %v338_v37 }
  0xae   : > { %v327_v3 = vpop.f32.mrf.mxu3 }
  0xaf   : > { %v328_v5 = vadd.f32 %v963_v28, %v327_v3 }
  0xb0   : > { %v297_v38 = vpop.f32.mrf.mxu0 }
  0xb1   : > { %v298_v39 = vadd.f32 %v963_v28, %v297_v38  ;;  %v349_v7 = vmax.f32 %v328_v5, 0.0 }
  0xb3   : > { %v339_v40 = vmax.f32 %v298_v39, 0.0 }
  0xb5   : > { %661 = vmatmul.msk.f32.gmra.mxu1 %vm361_vm1, %v339_v40 }
  0xb6   : > { %v330_v6 = vpop.f32.mrf.mxu3 }
  0xb7   : > { %v331_v8 = vadd.f32 %v963_v28, %v330_v6 }
  0xb8   : > { %v300_v41 = vpop.f32.mrf.mxu0 }
  0xb9   : > { %v301_v42 = vadd.f32 %v963_v28, %v300_v41  ;;  %v350_v9 = vmax.f32 %v331_v8, 0.0 }
  0xbb   : > { %v340_v43 = vmax.f32 %v301_v42, 0.0 }
  0xbd   : > { %662 = vmatmul.msk.f32.gmra.mxu1 %vm361_vm1, %v340_v43 }
  0xbe   : > { %v333_v10 = vpop.f32.mrf.mxu3 }
  0xbf   : > { %v334_v11 = vadd.f32 %v963_v28, %v333_v10 }
  0xc0   : > { %v303_v44 = vpop.f32.mrf.mxu0 }
  0xc1   : > { %v304_v45 = vadd.f32 %v963_v28, %v303_v44  ;;  %v351_v12 = vmax.f32 %v334_v11, 0.0 }
  0xc3   : > { %v341_v46 = vmax.f32 %v304_v45, 0.0 }
  0xc5   : > { %663 = vmatmul.msk.f32.gmra.mxu1 %vm361_vm1, %v341_v46 }
  0xc8   : > { %v306_v47 = vpop.f32.mrf.mxu0 }
  0xc9   : > { %v307_v48 = vadd.f32 %v963_v28, %v306_v47 }
  0xcb   : > { %v342_v49 = vmax.f32 %v307_v48, 0.0 }
  0xcd   : > { %664 = vmatmul.msk.f32.gmra.mxu1 %vm361_vm1, %v342_v49  ;;  %v216_v49 = vld [vmem:[%s1061_s3 + $0x3] sm:$0x1] }
  0xd0   : > { %v309_v50 = vpop.f32.mrf.mxu0 }
  0xd1   : > { %v310_v51 = vadd.f32 %v963_v28, %v309_v50  ;;  %v812_v50 = vmov 0  }
  0xd2   : > { %745 = vset.pattern.permute.xlu0 %v812_v50 }
  0xd3   : > { %v343_v52 = vmax.f32 %v310_v51, 0.0  ;;  %493 = vperm.xlu0 %745, %v216_v49  }
  0xd5   : > { %665 = vmatmul.msk.f32.gmra.mxu1 %vm361_vm1, %v343_v52 }
  0xd8   : > { %v312_v53 = vpop.f32.mrf.mxu0 }
  0xd9   : > { %v313_v54 = vadd.f32 %v963_v28, %v312_v53 }
  0xdb   : > { %v344_v55 = vmax.f32 %v313_v54, 0.0 }
  0xdd   : > { %666 = vmatmul.msk.f32.gmra.mxu1 %vm361_vm1, %v344_v55 }
  0xe0   : > { %v315_v56 = vpop.f32.mrf.mxu0 }
  0xe1   : > { %v316_v57 = vadd.f32 %v963_v28, %v315_v56 }
  0xe3   : > { %v345_v59 = vmax.f32 %v316_v57, 0.0 }
  0xe5   : > { %667 = vmatmul.msk.f32.gmra.mxu1 %vm361_vm1, %v345_v59 }
  0xe8   : > { %v318_v60 = vpop.f32.mrf.mxu0 }
  0xe9   : > { %v319_v61 = vadd.f32 %v963_v28, %v318_v60 }
  0xeb   : > { %v346_v62 = vmax.f32 %v319_v61, 0.0 }
  0xed   : > { %668 = vmatmul.msk.f32.vlgmr.msrb.gmra.mxu3 %vm361_vm1, %v346_v62 }
  0xf5   : > { %669 = vmatmul.msk.f32.gmra.mxu3 %vm361_vm1, %v347_v1 }
  0xfd   : > { %670 = vmatmul.msk.f32.gmra.mxu3 %vm361_vm1, %v348_v4 }
 0x105   : > { %671 = vmatmul.msk.f32.gmra.mxu3 %vm361_vm1, %v349_v7 }
 0x10d   : > { %672 = vmatmul.msk.f32.gmra.mxu3 %vm361_vm1, %v350_v9 }
 0x115   : > { %673 = vmatmul.msk.f32.gmra.mxu3 %vm361_vm1, %v351_v12 }
 0x11a   : > { %v997_v13 = vpop.f32.mrf.mxu1 }
 0x11b   : > { %v428_v61 = vadd.f32 %v747_v25, %v997_v13 }
 0x11d   : > { %v475_v63 = vmax.f32 %v428_v61, 0.0 }
 0x122   : > { %v430_v14 = vpop.f32.mrf.mxu1 }
 0x123   : > { %v431_v59 = vadd.f32 %v747_v25, %v430_v14 }
 0x125   : > { %v476_v62 = vmax.f32 %v431_v59, 0.0 }
 0x12a   : > { %v433_v15 = vpop.f32.mrf.mxu1 }
 0x12b   : > { %v434_v57 = vadd.f32 %v747_v25, %v433_v15 }
 0x12d   : > { %v477_v60 = vmax.f32 %v434_v57, 0.0 }
 0x132   : > { %v436_v16 = vpop.f32.mrf.mxu1 }
 0x133   : > { %v437_v55 = vadd.f32 %v747_v25, %v436_v16 }
 0x135   : > { %v478_v58 = vmax.f32 %v437_v55, 0.0 }
 0x13a   : > { %v439_v19 = vpop.f32.mrf.mxu1 }
 0x13b   : > { %v440_v53 = vadd.f32 %v747_v25, %v439_v19 }
 0x13d   : > { %v479_v56 = vmax.f32 %v440_v53, 0.0 }
 0x142   : > { %v442_v21 = vpop.f32.mrf.mxu1 }
 0x143   : > { %v443_v51 = vadd.f32 %v747_v25, %v442_v21 }
 0x145   : > { %v480_v54 = vmax.f32 %v443_v51, 0.0  ;;  %v494_v1 = vpop.permute.xlu0 %493 }
 0x14a   : > { %v445_v23 = vpop.f32.mrf.mxu1 }
 0x14b   : > { %v446_v47 = vadd.f32 %v747_v25, %v445_v23 }
 0x14d   : > { %v481_v52 = vmax.f32 %v446_v47, 0.0 }
 0x152   : > { %v448_v26 = vpop.f32.mrf.mxu1 }
 0x153   : > { %v449_v45 = vadd.f32 %v747_v25, %v448_v26 }
 0x155   : > { %v482_v48 = vmax.f32 %v449_v45, 0.0 }
 0x15a   : > { %v451_v33 = vpop.f32.mrf.mxu1 }
 0x15b   : > { %v452_v43 = vadd.f32 %v747_v25, %v451_v33 }
 0x15d   : > { %v483_v46 = vmax.f32 %v452_v43, 0.0 }
 0x162   : > { %v454_v40 = vpop.f32.mrf.mxu1 }
 0x163   : > { %v455_v41 = vadd.f32 %v747_v25, %v454_v40 }
 0x165   : > { %v484_v44 = vmax.f32 %v455_v41, 0.0 }
 0x170   : > { %v457_v17 = vpop.f32.mrf.mxu3 }
 0x171   : > { %v458_v38 = vadd.f32 %v747_v25, %v457_v17 }
 0x173   : > { %v485_v42 = vmax.f32 %v458_v38, 0.0 }
 0x178   : > { %v460_v18 = vpop.f32.mrf.mxu3 }
 0x179   : > { %v461_v36 = vadd.f32 %v747_v25, %v460_v18 }
 0x17b   : > { %v486_v39 = vmax.f32 %v461_v36, 0.0 }
 0x180   : > { %v463_v20 = vpop.f32.mrf.mxu3 }
 0x181   : > { %v464_v34 = vadd.f32 %v747_v25, %v463_v20 }
 0x183   : > { %v487_v37 = vmax.f32 %v464_v34, 0.0 }
 0x188   : > { %v466_v22 = vpop.f32.mrf.mxu3 }
 0x189   : > { %v467_v31 = vadd.f32 %v747_v25, %v466_v22 }
 0x18b   : > { %v488_v35 = vmax.f32 %v467_v31, 0.0 }
 0x190   : > { %v469_v24 = vpop.f32.mrf.mxu3 }
 0x191   : > { %v470_v29 = vadd.f32 %v747_v25, %v469_v24 }
 0x193   : > { %v489_v32 = vmax.f32 %v470_v29, 0.0 }
 0x198   : > { %v472_v27 = vpop.f32.mrf.mxu3 }
 0x199   : > { %v473_v28 = vadd.f32 %v747_v25, %v472_v27 }
 0x19b   : > { %v490_v30 = vmax.f32 %v473_v28, 0.0 }
 0x19d   : > { %674 = vmatpush.xpose.msk.msra.mxu2 %vm222_vm0, %v490_v30 }
 0x1a1   : > { %675 = vmatpush.xpose.msk.msra.mxu2 %vm222_vm0, %v489_v32 }
 0x1a5   : > { %676 = vmatpush.xpose.msk.msra.mxu2 %vm222_vm0, %v488_v35 }
 0x1a9   : > { %677 = vmatpush.xpose.msk.msra.mxu2 %vm222_vm0, %v487_v37 }
 0x1ad   : > { %678 = vmatpush.xpose.msk.msra.mxu2 %vm222_vm0, %v486_v39 }
 0x1b1   : > { %679 = vmatpush.xpose.msk.msra.mxu2 %vm222_vm0, %v485_v42 }
 0x1b5   : > { %680 = vmatpush.xpose.msk.msra.mxu2 %vm222_vm0, %v484_v44 }
 0x1b9   : > { %681 = vmatpush.xpose.msk.msra.mxu2 %vm222_vm0, %v483_v46 }
 0x1bd   : > { %682 = vmatpush.xpose.msk.msra.mxu2 %vm222_vm0, %v482_v48 }
 0x1c1   : > { %683 = vmatpush.xpose.msk.msra.mxu2 %vm222_vm0, %v481_v52 }
 0x1c5   : > { %684 = vmatpush.xpose.msk.msra.mxu2 %vm222_vm0, %v480_v54 }
 0x1c9   : > { %685 = vmatpush.xpose.msk.msra.mxu2 %vm222_vm0, %v479_v56 }
 0x1cd   : > { %686 = vmatpush.xpose.msk.msra.mxu2 %vm222_vm0, %v478_v58 }
 0x1d1   : > { %687 = vmatpush.xpose.msk.msra.mxu2 %vm222_vm0, %v477_v60 }
 0x1d5   : > { %688 = vmatpush.xpose.msk.msra.mxu2 %vm222_vm0, %v476_v62 }
 0x1d9   : > { %689 = vmatpush.xpose.msk.msra.mxu2 %vm222_vm0, %v475_v63 }
 0x1dc   : > { %690 = vmatmul.msk.f32.vlgmr.msra.gmra.mxu2 %vm222_vm0, %v215_v0 }
 0x25f   : > { %v564_v2 = vpop.f32.mrf.mxu2 }
 0x260   : > { %v565_v3 = vadd.f32 %v564_v2, %v494_v1 }
 0x262   : > { %567 = vst [vmem:[%s190_s8] sm:$0x1] %v565_v3 }
 0x263   : > { %775 = shalt.err (!%p772_p3)
}
 0x264   : > { %705 = dma.vmem_to_hbm [thread:$0]  (%p876_p5), %s580_s9, 16, %s582_s10, %s569_s11  }
 0x265 PF: > { %p711_p4 = scmp.ge.s32.totalorder %s810_s18, 2  ;;  %s593_s27 = sand.u32 1, %s798_s15  }
 0x266   : > { %s594_s28 = scalar_lea.sflag [#allocation3], %s593_s27 }
 0x267   : > { %p708_p7 = pnand %p711_p4, %p880_p6 }
 0x269   : > { %p709_p8 = pneg %p708_p7 }
 0x26b   : > { %793 = dma.done.wait (%p709_p8), %s594_s28, 16  }
 0x26c   : > { %795 = vsyncadd (%p709_p8), %s594_s28, 4294967280  ;;  %p14_p9 = scmp.ge.s32.totalorder %s863_s21, 4   ;;  %s1065_s15 = smov %s802_s16 }
 0x26d   : > { %s1066_s16 = smov %s806_s17  ;;  %s1067_s17 = smov %s874_s24 }
 0x26e   : > { %s1068_s18 = smov %s863_s21  ;;  %16 = sbr.rel (!%p14_p9) target bundleno = 3 (0x3), region = 71 }
 0x273   :  { %599 = vsyncpa [#allocation3], 1 }
 0x274   :  { %601 = vsyncpa [#allocation3 + $0x1], 1 }

</bundles_post_ra>
